<compile_context>
chip_gen: v7x
topology: tpu7x:2x2x1
jax: 0.10.0
libtpu: 0.0.40
codegen_flags: <defaults>
</compile_context>

<pallas_src>
import jax
import jax.numpy as jnp
from jax.experimental import pallas as pl
from jax.experimental.pallas import tpu as pltpu


# ----------------------------------------------------------------------------
# Host-side: fold replicate-padding + AvgPool1d(kernel_size, stride) into a matrix
# ----------------------------------------------------------------------------
def _build_avg_matrix(seq_len, kernel_size, stride, dtype):
    """A of shape (L_out, L) with out[b] = A @ x[b] reproducing moving_avg.forward."""
    p = (kernel_size - 1) // 2
    l_pad = seq_len + 2 * p
    l_out = (l_pad - kernel_size) // stride + 1
    o = jnp.arange(l_out)[:, None]                        # (L_out, 1) output positions
    j = jnp.arange(kernel_size)[None, :]                  # (1, k)     window offsets
    # padded index o*stride + j maps to original index clip(o*stride + j - p, 0, L-1)
    src = jnp.clip(o * stride + j - p, 0, seq_len - 1)    # (L_out, k)
    rows = jnp.broadcast_to(o, src.shape)
    a = jnp.zeros((l_out, seq_len), jnp.float32)
    a = a.at[rows, src].add(1.0 / kernel_size)            # duplicates (clipped) add up
    return a.astype(dtype), l_out


# ----------------------------------------------------------------------------
# Pallas kernel: one (batch-block, channel-block) tile per grid step
# ----------------------------------------------------------------------------
def moving_avg_kernel(x_ref, a_ref, o_ref):
    # x_ref: (Bb, L, Cb)   a_ref: (L_out, L)   o_ref: (Bb, L_out, Cb)
    a = a_ref[...]
    for i in range(x_ref.shape[0]):            # static unroll over the batch block
        o_ref[i] = jnp.dot(a, x_ref[i],
                           preferred_element_type=jnp.float32).astype(o_ref.dtype)


# ----------------------------------------------------------------------------
# Block-size heuristics
# ----------------------------------------------------------------------------
def _choose_block_b(batch):
    # Amortize per-step overhead (cap the static unroll) but keep >= 2 grid steps when
    # batch >= 2 so both v7x TensorCores get work.
    for cand in (8, 4, 2, 1):
        if batch % cand == 0 and batch // cand >= 2:
            return cand
    return batch  # batch == 1


def _choose_block_c(c):
    # Only tile the lane dimension when it is large and 128-aligned; otherwise a full
    # (non-tiled) last dim is always legal under the (8,128) rule.
    if c % 128 != 0:
        return c
    for cand in (512, 256, 128):
        if c % cand == 0 and c > cand:
            return cand
    return c


# ----------------------------------------------------------------------------
# Wrapper
# ----------------------------------------------------------------------------
def moving_avg(x, kernel_size, stride, block_b=None, block_c=None):
    b, l, c = x.shape
    a, l_out = _build_avg_matrix(l, kernel_size, stride, x.dtype)
    bb = block_b if block_b is not None else _choose_block_b(b)
    cb = block_c if block_c is not None else _choose_block_c(c)
    assert b % bb == 0, (b, bb)
    assert c % cb == 0, (c, cb)

    itemsize = jnp.dtype(x.dtype).itemsize
    cost = pl.CostEstimate(
        flops=2 * b * l_out * l * c,
        transcendentals=0,
        bytes_accessed=(b * l * c + l_out * l + b * l_out * c) * itemsize,
    )

    return pl.pallas_call(
        moving_avg_kernel,
        out_shape=jax.ShapeDtypeStruct((b, l_out, c), x.dtype),
        grid_spec=pltpu.PrefetchScalarGridSpec(
            num_scalar_prefetch=0,
            grid=(b // bb, c // cb),
            in_specs=[
                pl.BlockSpec((bb, l, cb), lambda g, h: (g, 0, h)),    # x tile
                pl.BlockSpec((l_out, l), lambda g, h: (0, 0)),        # averaging matrix
            ],
            out_specs=pl.BlockSpec((bb, l_out, cb), lambda g, h: (g, 0, h)),
        ),
        compiler_params=pltpu.CompilerParams(
            dimension_semantics=("parallel", "parallel")),
        cost_estimate=cost,
    )(x, a)


# ----------------------------------------------------------------------------
# Pure-JAX reference (mirrors the PyTorch forward exactly)
# ----------------------------------------------------------------------------
def moving_avg_ref(x, kernel_size, stride):
    p = (kernel_size - 1) // 2
    front = jnp.repeat(x[:, :1, :], p, axis=1)
    end = jnp.repeat(x[:, -1:, :], p, axis=1)
    xp = jnp.concatenate([front, x, end], axis=1)        # (B, L+2p, C)
    l_pad = xp.shape[1]
    l_out = (l_pad - kernel_size) // stride + 1
    win = jnp.stack(
        [xp[:, i * stride:i * stride + kernel_size, :] for i in range(l_out)], axis=1
    )                                                     # (B, L_out, k, C)
    return win.mean(axis=2)                               # (B, L_out, C)


# ----------------------------------------------------------------------------
# Main
# ----------------------------------------------------------------------------
if __name__ == "__main__":
    B, L, C = 2, 16, 8   # (batch, seq_len, input_size)
    key = jax.random.PRNGKey(0)
    x = jax.random.normal(key, (B, L, C), jnp.float32)

    # primary config: kernel_size=5, stride=1  (output shape == input shape)
    out = jax.block_until_ready(moving_avg(x, kernel_size=5, stride=1))
    ref = moving_avg_ref(x, kernel_size=5, stride=1)
    assert out.shape == ref.shape == (B, L, C), (out.shape, ref.shape)
    assert jnp.allclose(out, ref, atol=1e-5, rtol=1e-5), \
        f"max abs err = {jnp.max(jnp.abs(out - ref))}"

    # general-stride check: kernel_size=3, stride=2
    out2 = jax.block_until_ready(moving_avg(x, kernel_size=3, stride=2))
    ref2 = moving_avg_ref(x, kernel_size=3, stride=2)
    assert out2.shape == ref2.shape, (out2.shape, ref2.shape)
    assert jnp.allclose(out2, ref2, atol=1e-5, rtol=1e-5), \
        f"max abs err = {jnp.max(jnp.abs(out2 - ref2))}"

    print("KERNEL_OK")
</pallas_src>

<mosaic_0001>
module attributes {stable_mosaic.version = 11 : i64} {
  func.func @moving_avg_kernel(%arg0: i32, %arg1: i32, %arg2: memref<1x16x8xf32, #tpu.memory_space<vmem>>, %arg3: memref<16x16xf32, #tpu.memory_space<vmem>>, %arg4: memref<1x16x8xf32, #tpu.memory_space<vmem>>) attributes {dimension_semantics = [#tpu.dimension_semantics<parallel>, #tpu.dimension_semantics<parallel>], iteration_bounds = array<i64: 2, 1>, scalar_prefetch = 0 : i64, scratch_operands = 0 : i64, tpu.core_type = #tpu.core_type<tc>, window_params = [{transform_indices = @transform_0, window_bounds = array<i64: 1, 16, 8>}, {pipeline_mode = #tpu.pipeline_mode<synchronous>, transform_indices = @transform_1, window_bounds = array<i64: 16, 16>}, {transform_indices = @transform_2, window_bounds = array<i64: 1, 16, 8>}]} {
    %c0 = arith.constant 0 : index
    %c0_0 = arith.constant 0 : index
    %0 = vector.load %arg3[%c0, %c0_0] : memref<16x16xf32, #tpu.memory_space<vmem>>, vector<16x16xf32>
    %c0_1 = arith.constant 0 : index
    %c0_2 = arith.constant 0 : index
    %c0_3 = arith.constant 0 : index
    %1 = vector.load %arg2[%c0_1, %c0_2, %c0_3] : memref<1x16x8xf32, #tpu.memory_space<vmem>>, vector<1x16x8xf32>
    %2 = vector.shape_cast %1 : vector<1x16x8xf32> to vector<16x8xf32>
    %cst = arith.constant dense<0.000000e+00> : vector<16x8xf32>
    %3 = tpu.matmul %0, %2, %cst {dimension_numbers = #tpu.dot_dimension_numbers<[1], [0], [0], [1], [0, 0, 1, 1], [], []>} : vector<16x16xf32>, vector<16x8xf32>, vector<16x8xf32> -> vector<16x8xf32>
    %c0_4 = arith.constant 0 : index
    %c0_5 = arith.constant 0 : index
    %c0_6 = arith.constant 0 : index
    %4 = vector.load %arg4[%c0_4, %c0_5, %c0_6] : memref<1x16x8xf32, #tpu.memory_space<vmem>>, vector<1x16x8xf32>
    %5 = vector.shape_cast %4 : vector<1x16x8xf32> to vector<16x8xf32>
    %6 = vector.shape_cast %3 : vector<16x8xf32> to vector<1x16x8xf32>
    tpu.vector_store %arg4[%c0_4, %c0_5, %c0_6], %6 {strides = array<i32>} : memref<1x16x8xf32, #tpu.memory_space<vmem>>, vector<1x16x8xf32>,
    return
  }
  func.func @transform_0(%arg0: i32, %arg1: i32) -> (i32, i32, i32) {
    %c0_i32 = arith.constant 0 : i32
    %c0_i32_0 = arith.constant 0 : i32
    return %arg0, %c0_i32, %arg1 : i32, i32, i32
  }
  func.func @transform_1(%arg0: i32, %arg1: i32) -> (i32, i32) {
    %c0_i32 = arith.constant 0 : i32
    %c0_i32_0 = arith.constant 0 : i32
    %c0_i32_1 = arith.constant 0 : i32
    return %c0_i32, %c0_i32_0 : i32, i32
  }
  func.func @transform_2(%arg0: i32, %arg1: i32) -> (i32, i32, i32) {
    %c0_i32 = arith.constant 0 : i32
    %c0_i32_0 = arith.constant 0 : i32
    return %arg0, %c0_i32, %arg1 : i32, i32, i32
  }
}

</mosaic_0001>

<bundles_post_ra>
// kernel: tpu_custom_call.1
= control target key start
LH: loop header
LB: loop body
LE: loop exit
PB: predicated region body
PF: predicated region fallthrough
CT: control target
= control target key end

     0   :  { %s440_s9 = smov 0   ;;  %s442_s10 = smov 0   ;;  %s476_s0 = inlined_call_operand.vmem [shape: f32[2,16,8], index: 0, kind: input, shape index: {}]   ;;  %s477_s1 = inlined_call_operand.vmem [shape: f32[16,16], index: 1, kind: input, shape index: {}]   ;;  %s478_s2 = inlined_call_operand.vmem [shape: f32[2,16,8], index: 2, kind: output, shape index: {}]  }
   0x1   :  { %s444_s11 = smov 0  }
   0x2 LB: > { %s24_s12 = sadd.s32 1, %s419_s10  ;;  %p351_p0 = scmp.ge.s32.totalorder %s423_s11, 1  ;;  %s423_s11 = sphi %s444_s11, %s12_s11   ;;  %s419_s10 = sphi %s442_s10, %s480_s10   ;;  %s415_s9 = sphi %s440_s9, %s479_s9  }
   0x3   : > { %p26_p1 = scmp.ge.s32.totalorder %s24_s12, 2  ;;  %p131_p2 = scmp.lt.s32.totalorder %s423_s11, 3 }
   0x5   : > { %s482_s12 = smov (%p26_p1, %s24_s12), 0  ;;  %p132_p3 = pnand %p351_p0, %p131_p2 }
   0x6   : > { %p159_p4 = scmp.lt.s32.totalorder (!%p132_p3), %s415_s9, 1  ;;  %v175_v0 = vld [vmem:[%s477_s1] sm:$0xff] (!%p132_p3)  ;;  %vm179_vm0 = vcmask (!%p132_p3), 130048   ;;  %v176_v4 = vld [vmem:[%s477_s1 + $0x8] sm:$0xff] (!%p132_p3)  ;;  %vm261_vm1 = vcmask (!%p132_p3), 64512  }
   0x7   : > { %135 = sbr.rel (%p132_p3) target bundleno = 238 (0xee), region = 28  ;;  %370 = vmatprep.mubr.msk.f32.mxu0 (!%p132_p3), %vm179_vm0, %v175_v0 }
   0xe   : > { %s484_s9 = smov (!%p159_p4, %s415_s9), 1 }
   0xf   : > { %s360_s15 = sshll.u32 %s484_s9, 4 }
  0x10   : > { %s166_s18 = scalar_lea.vmem %s476_s0, %s360_s15  ;;  %s174_s23 = scalar_lea.vmem %s478_s2, %s360_s15 }
  0x11   : > { %v177_v1 = vld [vmem:[%s166_s18] sm:$0xff]  ;;  %v178_v2 = vld [vmem:[%s166_s18 + $0x8] sm:$0xff] }
  0x12   : > { %v373_v3 = vpack.c.bf16 %v178_v2, %v177_v1 }
  0x14   : > { %374 = vmatprep.subr.bf16.mxu0 %v373_v3 }
  0x15   : > { %376 = vmatpush3.bf16.msra.mxu0 %v373_v3 }
  0x18   : > { %371 = vmatmul.mubr.msk.f32.vlgmr.msra.gmra.mrb[0].mxu0 %vm179_vm0, %v176_v4 }
  0xeb   : > { %v372_v5 = vpop.f32.mrb[0].mxu0 }
  0xec   : > { %263 = vst.msk [vmem:[%s174_s23 + $0x8] sm:$0xff] %vm261_vm1, %v372_v5  ;;  %v252_v6 = vpop.f32.mrb[1].mxu0 }
  0xed   : > { %262 = vst.msk [vmem:[%s174_s23] sm:$0xff] %vm261_vm1, %v252_v6 }
  0xee PF: > { %s12_s11 = sadd.s32 1, %s423_s11   ;;  %s479_s9 = smov %s419_s10 }
  0xef   : > { %p9_p5 = scmp.ge.s32.totalorder %s12_s11, 4   ;;  %s480_s10 = smov %s482_s12 }
  0xf1   :  { %11 = sbr.rel (!%p9_p5) target bundleno = 2 (0x2), region = 58 }

</bundles_post_ra>
